<compile_context>
chip_gen: v7x
topology: tpu7x:2x2x1
jax: 0.10.0
libtpu: 0.0.40
codegen_flags: <defaults>
</compile_context>

<pallas_src>
import functools

import jax
import jax.numpy as jnp
from jax.experimental import pallas as pl
from jax.experimental.pallas import tpu as pltpu


def _rope_half_table_kernel(inv_freq_ref, table_ref):
    """One sequence-tile of the packed, transposed half RoPE table.

    inv_freq_ref : (half_pad, 1) f32  -- inverse frequencies (column vector,
                                         zero-padded rows are sliced off later)
    table_ref    : (2, half_pad, TILE_P) output tile; lane axis = positions;
                   index 0 = cos, index 1 = sin.
    """
    _, half_pad, tile_p = table_ref.shape
    i = pl.program_id(0)
    # Absolute positions for this tile along the lane axis.
    pos = (i * tile_p
           + jax.lax.broadcasted_iota(jnp.int32, (half_pad, tile_p), 1)
           ).astype(jnp.float32)
    # Outer product via lane-broadcast of the (half_pad, 1) column.
    freqs = inv_freq_ref[...] * pos                       # (half_pad, tile_p)
    # cos/sin evaluated ONCE per (position, frequency) pair (EUP dedup);
    # compute in f32, cast on the store (safe on v5e's f32-only EUP).
    table_ref[0, :, :] = jnp.cos(freqs).astype(table_ref.dtype)
    table_ref[1, :, :] = jnp.sin(freqs).astype(table_ref.dtype)


def _choose_tile_p(seq_len: int, half_pad: int, table_dtype,
                   vmem_budget_bytes: int = 12 * 1024 * 1024) -> int:
    """Largest lane tile (multiple of 128, <=8192) fitting the VMEM budget.

    Budget default (12 MiB) is safe under v5e's 16 MiB scoped-VMEM default;
    real usage is far below it (blocks are ~half_pad*tile_p*itemsize).
    """
    itemsize = jnp.dtype(table_dtype).itemsize
    seq_rounded = pl.cdiv(seq_len, 128) * 128
    # Packed (2, half_pad, tile_p) output x 2 pipeline buffers per lane.
    bytes_per_lane = 2 * half_pad * itemsize * 2
    max_tile = max(128, vmem_budget_bytes // bytes_per_lane)
    tile_p = min(8192, max_tile, seq_rounded)
    # Keep >=2 grid steps whenever the sequence allows, so the sequence axis
    # can genuinely be split across v7x's two TensorCores (each with its own
    # EUP).  Costs one extra ~0.35us grid step elsewhere.
    if seq_rounded >= 256:
        tile_p = min(tile_p, seq_rounded // 2)
    tile_p = max(128, (tile_p // 128) * 128)
    return tile_p


def _on_v7x_class_device() -> bool:
    try:
        kind = jax.devices()[0].device_kind.lower()
    except Exception:  # no devices / unexpected backend
        return False
    return ("v7" in kind) or ("7x" in kind)


@functools.partial(
    jax.jit,
    static_argnames=("half_pad", "tile_p", "padded_seq", "table_dtype",
                     "use_core_parallel"))
def _build_rope_half_tables(inv_freq_col, *, half_pad, tile_p, padded_seq,
                            table_dtype, use_core_parallel):
    grid = (padded_seq // tile_p,)
    # CORE_PARALLEL actually shards the grid axis across the 2 TCs on v7x
    # (each TC has its own EUP => ~2x on this EUP-bound build); "parallel"
    # elsewhere.
    seq_sem = pltpu.CORE_PARALLEL if use_core_parallel else "parallel"
    table = pl.pallas_call(
        _rope_half_table_kernel,
        out_shape=jax.ShapeDtypeStruct((2, half_pad, padded_seq), table_dtype),
        grid_spec=pltpu.PrefetchScalarGridSpec(
            num_scalar_prefetch=0,
            grid=grid,
            in_specs=[
                # Tiny (half_pad, 1) column; same full block every grid step.
                pl.BlockSpec((half_pad, 1), lambda i: (0, 0)),
            ],
            out_specs=pl.BlockSpec((2, half_pad, tile_p),
                                   lambda i: (0, 0, i)),
        ),
        compiler_params=pltpu.CompilerParams(
            dimension_semantics=(seq_sem,)),
    )(inv_freq_col)
    return table


class RotaryEmbedding:
    """JAX/Pallas port: precompute packed RoPE cos/sin half-tables."""

    def __init__(self, rope_dims: int, max_position_embeddings: int,
                 rope_theta: float = 10000.0, table_dtype=jnp.float32):
        dim = rope_dims
        seq_len = max_position_embeddings
        assert dim % 2 == 0, "rope_dims must be even"
        half = dim // 2
        half_pad = max(8, ((half + 7) // 8) * 8)   # full (8,128) vregs

        # inv_freq = 1 / theta ** (arange(0, dim, 2) / dim) -- plain-JAX glue,
        # identical formula to the reference.  Padded rows are zero (cos=1,
        # sin=0) and sliced off on read.
        exponents = jnp.arange(0, dim, 2, dtype=jnp.float32) / dim
        inv_freq = 1.0 / (rope_theta ** exponents)              # (half,)
        inv_freq_col = jnp.zeros((half_pad, 1), jnp.float32)
        inv_freq_col = inv_freq_col.at[:half, 0].set(inv_freq)

        tile_p = _choose_tile_p(seq_len, half_pad, table_dtype)
        padded_seq = pl.cdiv(seq_len, tile_p) * tile_p

        use_cp = _on_v7x_class_device()
        try:
            table = _build_rope_half_tables(
                inv_freq_col, half_pad=half_pad, tile_p=tile_p,
                padded_seq=padded_seq, table_dtype=table_dtype,
                use_core_parallel=use_cp)
            table = jax.block_until_ready(table)
        except Exception:
            if not use_cp:
                raise
            # Safe fallback if CORE_PARALLEL is rejected on this toolchain.
            table = jax.block_until_ready(_build_rope_half_tables(
                inv_freq_col, half_pad=half_pad, tile_p=tile_p,
                padded_seq=padded_seq, table_dtype=table_dtype,
                use_core_parallel=False))

        # Stored buffer stays in the kernel's packed, lane-dense layout:
        #   (2, half_pad, padded_seq); [0]=cos-half, [1]=sin-half.
        self._table = table
        self.dim = dim
        self.half = half
        self.seq_len = seq_len
        self._cos_full = None
        self._sin_full = None

    # ---- reference-buffer compatibility (lazy; full (seq, dim) tables are
    # ---- only materialized if explicitly requested, never during build). ----
    @property
    def cos(self):
        if self._cos_full is None:
            h = self._table[0, :self.half, :self.seq_len].T     # (seq, half)
            self._cos_full = jnp.concatenate([h, h], axis=-1)   # (seq, dim)
        return self._cos_full

    @property
    def sin(self):
        if self._sin_full is None:
            h = self._table[1, :self.half, :self.seq_len].T
            self._sin_full = jnp.concatenate([h, h], axis=-1)
        return self._sin_full

    def __call__(self, position_ids):
        # Reference forward() returns None (stub); standard RoPE gather is
        # provided as glue.  One gather over the packed table fetches both
        # cos and sin; duplication/transpose happens on the SMALL gathered
        # result only.
        # TODO(synk): fuse this gather (scalar-prefetch position_ids +
        # pl.Element row gather) and rotate-half apply into the attention
        # kernel for the per-step hot path.
        position_ids = jnp.asarray(position_ids)
        g = jnp.take(self._table, position_ids, axis=-1)   # (2, half_pad, *p)
        g = jnp.moveaxis(g, 1, -1)[..., :self.half]        # (2, *p, half)
        cos_h, sin_h = g[0], g[1]
        cos = jnp.concatenate([cos_h, cos_h], axis=-1)      # (*p, dim)
        sin = jnp.concatenate([sin_h, sin_h], axis=-1)
        return cos, sin


if __name__ == "__main__":
    ROPE_DIMS = 32
    MAX_POS = 128
    THETA = 10000.0

    rope = RotaryEmbedding(ROPE_DIMS, MAX_POS, THETA)

    # Deterministic example position_ids: [batch=2, seq=8]
    key = jax.random.PRNGKey(0)
    position_ids = jax.random.randint(key, (2, 8), 0, MAX_POS, dtype=jnp.int32)

    cos_g, sin_g = rope(position_ids)
    cos_g = jax.block_until_ready(cos_g)
    sin_g = jax.block_until_ready(sin_g)

    # Pure-JAX reference for correctness check of the Pallas-built tables.
    def ref_tables(dim, seq_len, theta):
        inv_freq = 1.0 / (theta ** (jnp.arange(0, dim, 2, dtype=jnp.float32)
                                    / dim))
        t = jnp.arange(seq_len, dtype=jnp.float32)
        freqs = jnp.outer(t, inv_freq)
        emb = jnp.concatenate([freqs, freqs], axis=-1)
        return jnp.cos(emb), jnp.sin(emb)

    cos_ref, sin_ref = ref_tables(ROPE_DIMS, MAX_POS, THETA)

    assert rope.cos.shape == (MAX_POS, ROPE_DIMS)
    assert rope.sin.shape == (MAX_POS, ROPE_DIMS)
    assert cos_g.shape == (2, 8, ROPE_DIMS) and sin_g.shape == (2, 8, ROPE_DIMS)
    assert jnp.allclose(rope.cos, cos_ref, atol=1e-5, rtol=1e-5)
    assert jnp.allclose(rope.sin, sin_ref, atol=1e-5, rtol=1e-5)
    assert jnp.allclose(cos_g, cos_ref[position_ids], atol=1e-5, rtol=1e-5)
    assert jnp.allclose(sin_g, sin_ref[position_ids], atol=1e-5, rtol=1e-5)

    # Padding path (seq_len not a tile multiple) + 2-grid-step path.
    rope2 = RotaryEmbedding(ROPE_DIMS, 200, THETA)
    cos_ref2, sin_ref2 = ref_tables(ROPE_DIMS, 200, THETA)
    assert rope2.cos.shape == (200, ROPE_DIMS)
    assert jnp.allclose(rope2.cos, cos_ref2, atol=1e-5, rtol=1e-5)
    assert jnp.allclose(rope2.sin, sin_ref2, atol=1e-5, rtol=1e-5)

    # Non-8-aligned half (rope_dims=20 -> half=10 padded to 16 sublanes).
    rope3 = RotaryEmbedding(20, 160, THETA)
    cos_ref3, sin_ref3 = ref_tables(20, 160, THETA)
    assert rope3.cos.shape == (160, 20)
    assert jnp.allclose(rope3.cos, cos_ref3, atol=1e-5, rtol=1e-5)
    assert jnp.allclose(rope3.sin, sin_ref3, atol=1e-5, rtol=1e-5)

    # Typical config (max_position_embeddings=2048): 2 x 1024-lane tiles.
    rope4 = RotaryEmbedding(ROPE_DIMS, 2048, THETA)
    cos_ref4, sin_ref4 = ref_tables(ROPE_DIMS, 2048, THETA)
    assert jnp.allclose(rope4.cos, cos_ref4, atol=1e-5, rtol=1e-5)
    assert jnp.allclose(rope4.sin, sin_ref4, atol=1e-5, rtol=1e-5)

    print("KERNEL_OK")
</pallas_src>

<mosaic_0001>
module attributes {stable_mosaic.version = 11 : i64} {
  func.func @_rope_half_table_kernel(%arg0: i32, %arg1: memref<16x1xf32, #tpu.memory_space<vmem>>, %arg2: memref<2x16x128xf32, #tpu.memory_space<vmem>>) attributes {dimension_semantics = [#tpu.dimension_semantics<parallel>], iteration_bounds = array<i64: 1>, scalar_prefetch = 0 : i64, scratch_operands = 0 : i64, tpu.core_type = #tpu.core_type<tc>, window_params = [{pipeline_mode = #tpu.pipeline_mode<synchronous>, transform_indices = @transform_0, window_bounds = array<i64: 16, 1>}, {transform_indices = @transform_1, window_bounds = array<i64: 2, 16, 128>}]} {
    %c128_i32 = arith.constant 128 : i32
    %0 = arith.muli %arg0, %c128_i32 : i32
    %1 = tpu.iota {dimensions = array<i32: 1>} : vector<16x128xi32>
    %2 = vector.broadcast %0 : i32 to vector<16x128xi32>
    %3 = arith.addi %2, %1 : vector<16x128xi32>
    %4 = arith.sitofp %3 : vector<16x128xi32> to vector<16x128xf32>
    %c0 = arith.constant 0 : index
    %c0_0 = arith.constant 0 : index
    %5 = vector.load %arg1[%c0, %c0_0] : memref<16x1xf32, #tpu.memory_space<vmem>>, vector<16x1xf32>
    %6 = vector.broadcast %5 : vector<16x1xf32> to vector<16x128xf32>
    %7 = arith.mulf %6, %4 : vector<16x128xf32>
    %8 = math.cos %7 : vector<16x128xf32>
    %c0_1 = arith.constant 0 : index
    %c0_2 = arith.constant 0 : index
    %c0_3 = arith.constant 0 : index
    %9 = vector.load %arg2[%c0_1, %c0_2, %c0_3] : memref<2x16x128xf32, #tpu.memory_space<vmem>>, vector<1x16x128xf32>
    %10 = vector.shape_cast %9 : vector<1x16x128xf32> to vector<16x128xf32>
    %11 = vector.shape_cast %8 : vector<16x128xf32> to vector<1x16x128xf32>
    tpu.vector_store %arg2[%c0_1, %c0_2, %c0_3], %11 {strides = array<i32>} : memref<2x16x128xf32, #tpu.memory_space<vmem>>, vector<1x16x128xf32>,
    %12 = math.sin %7 : vector<16x128xf32>
    %c1 = arith.constant 1 : index
    %c0_4 = arith.constant 0 : index
    %c0_5 = arith.constant 0 : index
    %13 = vector.load %arg2[%c1, %c0_4, %c0_5] : memref<2x16x128xf32, #tpu.memory_space<vmem>>, vector<1x16x128xf32>
    %14 = vector.shape_cast %13 : vector<1x16x128xf32> to vector<16x128xf32>
    %15 = vector.shape_cast %12 : vector<16x128xf32> to vector<1x16x128xf32>
    tpu.vector_store %arg2[%c1, %c0_4, %c0_5], %15 {strides = array<i32>} : memref<2x16x128xf32, #tpu.memory_space<vmem>>, vector<1x16x128xf32>,
    return
  }
  func.func @transform_0(%arg0: i32) -> (i32, i32) {
    %c0_i32 = arith.constant 0 : i32
    %c0_i32_0 = arith.constant 0 : i32
    %c0_i32_1 = arith.constant 0 : i32
    return %c0_i32, %c0_i32_0 : i32, i32
  }
  func.func @transform_1(%arg0: i32) -> (i32, i32, i32) {
    %c0_i32 = arith.constant 0 : i32
    %c0_i32_0 = arith.constant 0 : i32
    %c0_i32_1 = arith.constant 0 : i32
    return %c0_i32, %c0_i32_0, %arg0 : i32, i32, i32
  }
}

</mosaic_0001>

<bundles_post_ra>
// kernel: _build_rope_half_tables.1
= control target key start
LH: loop header
LB: loop body
LE: loop exit
PB: predicated region body
PF: predicated region fallthrough
CT: control target
= control target key end

     0   :  { %v531_v1 = vmov 0   ;;  %s629_s0 = inlined_call_operand.vmem [shape: f32[16,1], index: 0, kind: input, shape index: {}]   ;;  %s630_s1 = inlined_call_operand.hbm [shape: f32[2,16,128], index: 1, kind: output, shape index: {}]  }
   0x1   :  { %v15_v0 = vld [vmem:[%s629_s0] sm:$0xff]  ;;  %498 = vset.pattern.permute.xlu0 %v531_v1  ;;  %v16_v2 = vld [vmem:[%s629_s0 + $0x8] sm:$0xff] }
   0x2   :  { %19 = vperm.xlu0 %498, %v15_v0  }
   0x3   :  { %6 = vsyncpa [#allocation3], 0  ;;  %v10_v3 = vlaneseq  ;;  %v532_v26 = vmov 683565275   ;;  %v533_v30 = vmov 2475754826  }
   0x4   :  { %v534_v32 = vmov 2131351028   ;;  %v535_v34 = vmov 2102212464   ;;  %v536_v36 = vmov 920167782  }
   0x5   :  { %v11_v4 = vand.u32 127, %v10_v3  ;;  %v537_v43 = vmov 1326507024   ;;  %s538_s0 = smov [#allocation2]  }
   0x6   :  { %24 = vperm.xlu0 %498, %v16_v2   ;;  %s453_s10 = sshll.u32 %s538_s0, 4  ;;  %s454_s10 = int_to_ptr.vmem [resolvable:$true] %s453_s10 }
   0x7   :  { %v14_v5 = vcvt.s32.f32 %v11_v4  ;;  %s507_s11 = scalar_lea.vmem %s454_s10, 512  ;;  %p512_p1 = scmp.lt.s32.totalorder %s454_s10, %s454_s10 }
   0x8   :  { %p508_p0 = scmp.ne.s32.totalorder %s454_s10, %s507_s11  ;;  %p513_p2 = scmp.lt.s32.totalorder %s507_s11, %s507_s11 }
   0xa   :  { %p514_p3 = por %p513_p2, %p512_p1 }
   0xc   :  { %p515_p4 = pnand %p514_p3, %p508_p0 }
  0x81   :  { %v20_v6 = vpop.permute.xlu0 %19 }
  0x82   :  { %v557_v7 = vmul.f32 %v20_v6, %v14_v5 }
  0x84   :  { %v29_v8 = vand.u32 2147483647, %v557_v7  ;;  %v32_v9 = vand.u32 2139095040, %v557_v7  ;;  %vm31_vm14 = vcmp.lt.s32.totalorder %v557_v7, 0 }
  0x85   :  { %v25_v10 = vpop.permute.xlu0 %24 }
  0x86   :  { %v33_v11 = vshrl.u32 %v32_v9, 23  ;;  %v561_v12 = vmul.f32 %v25_v10, %v14_v5  ;;  %v36_v13 = vand.u32 8388607, %v29_v8  ;;  %vm30_vm15 = vcmp.le.f32.partialorder %v29_v8, 0.7853982 }
  0x88   :  { %v464_v14 = vadd.s32 4294967169, %v33_v11  ;;  %v135_v15 = vand.u32 2139095040, %v561_v12  ;;  %v37_v17 = vor.u32 8388608, %v36_v13  ;;  %v132_v19 = vand.u32 2147483647, %v561_v12 }
  0x8a   :  { %v39_v16 = vadd.s32 1, %v464_v14  ;;  %v136_v18 = vshrl.u32 %v135_v15, 23  ;;  %v567_v24 = vshll.u32 %v37_v17, 8  ;;  %v139_v28 = vand.u32 8388607, %v132_v19 }
  0x8c   :  { %vm40_vm0 = vcmp.gt.s32.totalorder %v39_v16, 0  ;;  %v468_v21 = vadd.s32 4294967169, %v136_v18  ;;  %v140_v58 = vor.u32 8388608, %v139_v28 }
  0x8d   :  { %v41_v20 = vsel %vm40_vm0, %v39_v16, 0  ;;  %vm134_vm0 = vcmp.lt.s32.totalorder %v561_v12, 0 }
  0x8e   :  { %v42_v22 = vshrl.u32 %v41_v20, 5  ;;  %v43_v23 = vand.u32 31, %v41_v20  ;;  %v142_v29 = vadd.s32 1, %v468_v21  ;;  %v180_v9 = vshll.u32 %v140_v58, 8 }
  0x90   :  { %v44_v25 = vsub.s32 32, %v43_v23  ;;  %v46_v27 = vshll.u32 %v532_v26, %v43_v23  ;;  %v49_v31 = vshll.u32 %v533_v30, %v43_v23  ;;  %v52_v33 = vshll.u32 %v534_v32, %v43_v23 }
  0x91   :  { %v55_v35 = vshll.u32 %v535_v34, %v43_v23  ;;  %v58_v37 = vshll.u32 %v536_v36, %v43_v23  ;;  %vm61_vm1 = vcmp.lt.s32.totalorder %v42_v22, 1  ;;  %vm63_vm2 = vcmp.lt.s32.totalorder %v42_v22, 3 }
  0x92   :  { %v47_v38 = vshrl.u32 %v533_v30, %v44_v25  ;;  %v50_v39 = vshrl.u32 %v534_v32, %v44_v25  ;;  %v53_v40 = vshrl.u32 %v535_v34, %v44_v25  ;;  %v45_v41 = vshrl.u32 %v532_v26, %v44_v25 }
  0x93   :  { %v56_v42 = vshrl.u32 %v536_v36, %v44_v25  ;;  %v59_v44 = vshrl.u32 %v537_v43, %v44_v25  ;;  %vm143_vm3 = vcmp.gt.s32.totalorder %v142_v29, 0  ;;  %vm64_vm4 = vcmp.lt.s32.totalorder %v42_v22, 4 }
  0x94   :  { %v48_v45 = vor.u32 %v47_v38, %v46_v27  ;;  %v51_v46 = vor.u32 %v50_v39, %v49_v31  ;;  %v54_v47 = vor.u32 %v53_v40, %v52_v33  ;;  %v144_v50 = vsel %vm143_vm3, %v142_v29, 0 }
  0x95   :  { %v57_v48 = vor.u32 %v56_v42, %v55_v35  ;;  %v60_v49 = vor.u32 %v59_v44, %v58_v37  ;;  %vm62_vm5 = vcmp.lt.s32.totalorder %v42_v22, 2  ;;  %v146_v61 = vand.u32 31, %v144_v50 }
  0x96   :  { %v65_v51 = vsel %vm61_vm1, %v45_v41, %v48_v45  ;;  %v66_v52 = vsel %vm64_vm4, %v54_v47, 2102212464  ;;  %v69_v53 = vsel %vm61_vm1, %v48_v45, %v51_v46  ;;  %v73_v54 = vsel %vm61_vm1, %v51_v46, %v54_v47 }
  0x97   :  { %v67_v55 = vsel %vm63_vm2, %v51_v46, %v66_v52  ;;  %v70_v56 = vsel %vm64_vm4, %v57_v48, 920167782  ;;  %v74_v57 = vsel %vm64_vm4, %v60_v49, 1326507024  ;;  %v145_v5 = vshrl.u32 %v144_v50, 5 }
  0x98   :  { %v71_v59 = vsel %vm63_vm2, %v54_v47, %v70_v56  ;;  %v75_v60 = vsel %vm63_vm2, %v57_v48, %v74_v57  ;;  %v68_v62 = vsel %vm62_vm5, %v65_v51, %v67_v55  ;;  %v147_v6 = vsub.s32 32, %v146_v61 }
  0x99   :  { %v72_v63 = vsel %vm62_vm5, %v69_v53, %v71_v59  ;;  %v76_v0 = vsel %vm62_vm5, %v73_v54, %v75_v60  ;;  %v84_v10 = vmul.u32 %v567_v24, %v68_v62  ;;  %v149_v11 = vshll.u32 %v532_v26, %v146_v61 }
  0x9a   :  { %v580_v1 = vmul.u32.u64.low %v567_v24, %v76_v0  ;;  %v581_v2 = vmul.u32.u64.high %v567_v24, %v76_v0, %v580_v1  ;;  %v584_v3 = vmul.u32.u64.low %v567_v24, %v72_v63  ;;  %v585_v4 = vmul.u32.u64.high %v567_v24, %v72_v63, %v584_v3 }
  0x9b   :  { %v152_v13 = vshll.u32 %v533_v30, %v146_v61  ;;  %v155_v14 = vshll.u32 %v534_v32, %v146_v61  ;;  %v150_v15 = vshrl.u32 %v533_v30, %v147_v6  ;;  %v153_v16 = vshrl.u32 %v534_v32, %v147_v6 }
  0x9c   :  { %v156_v17 = vshrl.u32 %v535_v34, %v147_v6  ;;  %v158_v18 = vshll.u32 %v535_v34, %v146_v61  ;;  %vm86_vm6 = vc.u32 %v581_v2, %v584_v3  ;;  %v87_v20 = vadd.s32 1, %v585_v4 }
  0x9d   :  { %v159_v21 = vshrl.u32 %v536_v36, %v147_v6  ;;  %v161_v22 = vshll.u32 %v536_v36, %v146_v61  ;;  %v151_v23 = vor.u32 %v150_v15, %v149_v11  ;;  %v154_v25 = vor.u32 %v153_v16, %v152_v13 }
  0x9e   :  { %v157_v27 = vor.u32 %v156_v17, %v155_v14  ;;  %v162_v28 = vshrl.u32 %v537_v43, %v147_v6  ;;  %v88_v24 = vsel %vm86_vm6, %v87_v20, %v585_v4  ;;  %vm164_vm7 = vcmp.lt.s32.totalorder %v145_v5, 1 }
  0x9f   :  { %v160_v29 = vor.u32 %v159_v21, %v158_v18  ;;  %vm167_vm8 = vcmp.lt.s32.totalorder %v145_v5, 4  ;;  %v89_v30 = vadd.s32 %v88_v24, %v84_v10  ;;  %vm166_vm9 = vcmp.lt.s32.totalorder %v145_v5, 3 }
  0xa0   :  { %v163_v31 = vor.u32 %v162_v28, %v161_v22  ;;  %v169_v32 = vsel %vm167_vm8, %v157_v27, 2102212464  ;;  %v148_v33 = vshrl.u32 %v532_v26, %v147_v6  ;;  %v172_v34 = vsel %vm164_vm7, %v151_v23, %v154_v25 }
  0xa1   :  { %v173_v35 = vsel %vm167_vm8, %v160_v29, 920167782  ;;  %v176_v37 = vsel %vm164_vm7, %v154_v25, %v157_v27  ;;  %v90_v38 = vadd.s32 536870912, %v89_v30  ;;  %vm165_vm10 = vcmp.lt.s32.totalorder %v145_v5, 2 }
  0xa2   :  { %v174_v36 = vsel %vm166_vm9, %v157_v27, %v173_v35  ;;  %v177_v39 = vsel %vm167_vm8, %v163_v31, 1326507024  ;;  %v168_v40 = vsel %vm164_vm7, %v148_v33, %v151_v23  ;;  %v170_v41 = vsel %vm166_vm9, %v154_v25, %v169_v32 }
  0xa3   :  { %v175_v42 = vsel %vm165_vm10, %v172_v34, %v174_v36  ;;  %v178_v43 = vsel %vm166_vm9, %v160_v29, %v177_v39  ;;  %v91_v44 = vshrl.u32 %v90_v38, 30  ;;  %v171_v50 = vsel %vm165_vm10, %v168_v40, %v170_v41 }
  0xa4   :  { %v179_v45 = vsel %vm165_vm10, %v176_v37, %v178_v43  ;;  %v595_v46 = vmul.u32.u64.low %v180_v9, %v175_v42  ;;  %v596_v47 = vmul.u32.u64.high %v180_v9, %v175_v42, %v595_v46  ;;  %v187_v53 = vmul.u32 %v180_v9, %v171_v50 }
  0xa5   :  { %v598_v48 = vmul.u32.u64.low %v180_v9, %v179_v45  ;;  %v599_v49 = vmul.u32.u64.high %v180_v9, %v179_v45, %v598_v48  ;;  %v92_v26 = vshll.u32 %v91_v44, 30  ;;  %v85_v1 = vadd.s32 %v584_v3, %v581_v2 }
  0xa6   :  { %v190_v52 = vadd.s32 1, %v596_v47  ;;  %v115_v23 = vsub.s32 4, %v91_v44  ;;  %vm133_vm1 = vcmp.le.f32.partialorder %v132_v19, 0.7853982  ;;  %vm121_vm8 = vweird.f32 %v557_v7 }
  0xa7   :  { %v93_v51 = vsub.s32 %v89_v30, %v92_v26  ;;  %vm189_vm11 = vc.u32 %v599_v49, %v595_v46  ;;  %v188_v2 = vadd.s32 %v595_v46, %v599_v49 }
  0xa8   :  { %v191_v55 = vsel %vm189_vm11, %v190_v52, %v596_v47  ;;  %v116_v32 = vsel %vm31_vm14, %v115_v23, %v91_v44 }
  0xa9   :  { %v95_v54 = vsub.s32 0, %v93_v51  ;;  %v192_v56 = vadd.s32 %v191_v55, %v187_v53  ;;  %v118_v37 = vsel %vm30_vm15, 0, %v116_v32 }
  0xaa   :  { %v330_v40 = vadd.s32 3, %v118_v37  ;;  %v122_v43 = vand.u32 3, %v118_v37 }
  0xab   :  { %v465_v57 = vmin.u32 %v95_v54, %v93_v51  ;;  %v193_v58 = vadd.s32 536870912, %v192_v56 }
  0xac   :  { %v331_v46 = vand.u32 3, %v330_v40  ;;  %vm127_vm2 = vcmp.eq.s32.totalorder %v122_v43, 2  ;;  %vm124_vm4 = vcmp.eq.s32.totalorder %v122_v43, 0  ;;  %vm123_vm6 = vcmp.lt.s32.totalorder %v122_v43, 2 }
  0xad   :  { %v97_v59 = vclz %v465_v57  ;;  %v194_v60 = vshrl.u32 %v193_v58, 30 }
  0xae   :  { %vm336_vm3 = vcmp.eq.s32.totalorder %v331_v46, 2  ;;  %vm333_vm5 = vcmp.eq.s32.totalorder %v331_v46, 0  ;;  %vm332_vm7 = vcmp.lt.s32.totalorder %v331_v46, 2 }
  0xaf   :  { %v466_v61 = vadd.s32 4294967294, %v97_v59  ;;  %v195_v62 = vshll.u32 %v194_v60, 30  ;;  %v218_v42 = vsub.s32 4, %v194_v60 }
  0xb1   :  { %vm467_vm12 = vcmp.lt.s32.totalorder %v466_v61, 0  ;;  %v196_v0 = vsub.s32 %v192_v56, %v195_v62  ;;  %v219_v44 = vsel %vm134_vm0, %v218_v42, %v194_v60 }
  0xb2   :  { %v100_v63 = vsel %vm467_vm12, 0, %v466_v61 }
  0xb3   :  { %v101_v4 = vsub.s32 32, %v100_v63  ;;  %v105_v5 = vsub.s32 4294967266, %v100_v63  ;;  %v198_v6 = vsub.s32 0, %v196_v0  ;;  %v102_v9 = vshll.u32 %v93_v51, %v100_v63 }
  0xb4   :  { %v221_v51 = vsel %vm133_vm1, 0, %v219_v44 }
  0xb5   :  { %v103_v10 = vshrl.u32 %v85_v1, %v101_v4  ;;  %v106_v11 = vadd.s32 127, %v105_v5  ;;  %v469_v13 = vmin.u32 %v198_v6, %v196_v0  ;;  %v434_v57 = vadd.s32 3, %v221_v51 }
  0xb6   :  { %v225_v60 = vand.u32 3, %v221_v51 }
  0xb7   :  { %v104_v14 = vor.u32 %v103_v10, %v102_v9  ;;  %v107_v15 = vshll.u32 %v106_v11, 23  ;;  %v200_v16 = vclz %v469_v13  ;;  %v435_v61 = vand.u32 3, %v434_v57 }
  0xb8   :  { %vm230_vm9 = vcmp.eq.s32.totalorder %v225_v60, 2  ;;  %vm227_vm11 = vcmp.eq.s32.totalorder %v225_v60, 0 }
  0xb9   :  { %v108_v17 = vor.u32 4788187, %v107_v15  ;;  %v470_v18 = vadd.s32 4294967294, %v200_v16  ;;  %v111_v21 = vcvt.s32.f32 %v104_v14  ;;  %vm440_vm10 = vcmp.eq.s32.totalorder %v435_v61, 2 }
  0xba   :  { %vm437_vm12 = vcmp.eq.s32.totalorder %v435_v61, 0 }
  0xbb   :  { %v109_v20 = vand.u32 2147483647, %v108_v17  ;;  %vm471_vm13 = vcmp.lt.s32.totalorder %v470_v18, 0 }
  0xbc   :  { %v203_v25 = vsel %vm471_vm13, 0, %v470_v18  ;;  %vm226_vm13 = vcmp.lt.s32.totalorder %v225_v60, 2 }
  0xbd   :  { %v112_v22 = vmul.f32 %v111_v21, %v109_v20  ;;  %v204_v3 = vsub.s32 32, %v203_v25  ;;  %v208_v27 = vsub.s32 4294967266, %v203_v25  ;;  %v205_v24 = vshll.u32 %v196_v0, %v203_v25 }
  0xbf   :  { %v113_v28 = vxor.u32 2147483648, %v112_v22  ;;  %v206_v29 = vshrl.u32 %v188_v2, %v204_v3  ;;  %v209_v30 = vadd.s32 127, %v208_v27 }
  0xc1   :  { %v114_v31 = vsel %vm31_vm14, %v113_v28, %v112_v22  ;;  %v207_v34 = vor.u32 %v206_v29, %v205_v24  ;;  %v210_v35 = vshll.u32 %v209_v30, 23  ;;  %vm436_vm14 = vcmp.lt.s32.totalorder %v435_v61, 2 }
  0xc2   :  { %v117_v33 = vsel %vm30_vm15, %v557_v7, %v114_v31  ;;  %vm224_vm15 = vweird.f32 %v561_v12 }
  0xc3   :  { %499 = vcosq.f32 %v117_v33  ;;  %v211_v38 = vor.u32 4788187, %v210_v35  ;;  %v214_v39 = vcvt.s32.f32 %v207_v34 }
  0xc4   :  { %501 = vsinq.f32 %v117_v33 }
  0xc5   :  { %v212_v36 = vand.u32 2147483647, %v211_v38 }
  0xc7   :  { %v215_v41 = vmul.f32 %v214_v39, %v212_v36 }
  0xc9   :  { %v216_v45 = vxor.u32 2147483648, %v215_v41 }
  0xcb   :  { %v217_v8 = vsel %vm134_vm0, %v216_v45, %v215_v41 }
  0xcc   :  { %v220_v48 = vsel %vm133_vm1, %v561_v12, %v217_v8 }
  0xcd   :  { %v500_v47 = vpop.eup %499  ;;  %503 = vcosq.f32 %v220_v48 }
  0xce   :  { %v502_v49 = vpop.eup %501  ;;  %v128_v26 = vxor.u32 2147483648, %v500_v47  ;;  %505 = vsinq.f32 %v220_v48 }
  0xcf   :  { %v125_v50 = vxor.u32 2147483648, %v502_v49 }
  0xd0   :  { %v129_v52 = vsel %vm127_vm2, %v128_v26, %v502_v49  ;;  %v338_v53 = vsel %vm336_vm3, %v128_v26, %v502_v49 }
  0xd1   :  { %v126_v54 = vsel %vm124_vm4, %v500_v47, %v125_v50  ;;  %v335_v19 = vsel %vm333_vm5, %v500_v47, %v125_v50 }
  0xd2   :  { %v130_v55 = vsel %vm123_vm6, %v126_v54, %v129_v52  ;;  %v339_v56 = vsel %vm332_vm7, %v335_v19, %v338_v53 }
  0xd3   :  { %v131_v58 = vsel %vm121_vm8, nan, %v130_v55  ;;  %v340_v59 = vsel %vm121_vm8, nan, %v339_v56 }
  0xd4   :  { %235 = vst [vmem:[#allocation2] sm:$0xff] %v131_v58  ;;  %446 = vst [vmem:[#allocation2 + $0x10] sm:$0xff] %v340_v59 }
  0xd7   :  { %v504_v62 = vpop.eup %503 }
  0xd8   :  { %v506_v63 = vpop.eup %505  ;;  %v231_v0 = vxor.u32 2147483648, %v504_v62 }
  0xd9   :  { %v228_v1 = vxor.u32 2147483648, %v506_v63 }
  0xda   :  { %v232_v4 = vsel %vm230_vm9, %v231_v0, %v506_v63  ;;  %v442_v7 = vsel %vm440_vm10, %v231_v0, %v506_v63 }
  0xdb   :  { %v229_v5 = vsel %vm227_vm11, %v504_v62, %v228_v1  ;;  %v439_v6 = vsel %vm437_vm12, %v504_v62, %v228_v1 }
  0xdc   :  { %v233_v9 = vsel %vm226_vm13, %v229_v5, %v232_v4  ;;  %v443_v10 = vsel %vm436_vm14, %v439_v6, %v442_v7 }
  0xdd   :  { %v234_v11 = vsel %vm224_vm15, nan, %v233_v9  ;;  %v444_v13 = vsel %vm224_vm15, nan, %v443_v10 }
  0xde   :  { %236 = vst [vmem:[#allocation2 + $0x8] sm:$0xff] %v234_v11  ;;  %447 = vst [vmem:[#allocation2 + $0x18] sm:$0xff] %v444_v13 }
  0xdf   :  { %518 = shalt.err (!%p515_p4)
}
  0xe0   :  { %s519_s14 = scalar_lea.hbm %s630_s1, 512 }
  0xe1   :  { %p520_p5 = scmp.ne.s32.totalorder %s630_s1, %s519_s14  ;;  %p523_p6 = scmp.lt.u32.totalorder %s519_s14, %s630_s1 }
  0xe3   :  { %p525_p7 = pnand %p523_p6, %p520_p5 }
  0xe5   :  { %528 = shalt.err (!%p525_p7)
}
  0xe6   :  { %s539_s19 = smov 128   ;;  %s540_s20 = smov 8  }
  0xe7   :  { %459 = dma.vmem_to_hbm [thread:$0]  %s454_s10, 512, %s630_s1, [#allocation3], %s539_s19, %s539_s19, %s540_s20  }
  0xe8   :  { %529 = dma.done.wait [#allocation3], 512  }
  0xe9   :  { %530 = vsyncadd [#allocation3], 4294966784 }
  0xea   :  { %463 = vsyncpa [#allocation3], 1 }

</bundles_post_ra>
